<compile_context>
chip_gen: v7x
topology: tpu7x:2x2x1
jax: 0.10.0
libtpu: 0.0.40
codegen_flags: <defaults>
</compile_context>

<pallas_src>
import jax
import jax.numpy as jnp
from jax.experimental import pallas as pl
from jax.experimental.pallas import tpu as pltpu

EPS = 1e-5  # PyTorch LayerNorm default eps


# ----------------------------- Pallas kernel ------------------------------

def _layernorm_f32(x, g, b):
    # Single-pass statistics: var = E[x^2] - mu^2 so the two cross-lane
    # reductions are independent (less XLU serialization than two-pass).
    mu = jnp.mean(x, axis=-1, keepdims=True)
    m2 = jnp.mean(x * x, axis=-1, keepdims=True)
    var = m2 - mu * mu
    return (x - mu) * jax.lax.rsqrt(var + EPS) * g + b


def video_token_kernel(x1_ref, x2_ref,
                       w1_ref, b1_ref, g1_ref, be1_ref, g2_ref, be2_ref,
                       wc_ref, bc_ref, pos1_ref, pos2_ref, cls_ref,
                       o_ref):
    """Fused per-(batch, frame) video-token kernel.

    stream 1: LayerNorm(K) -> Linear(K,E) [bf16 MXU, f32 acc] -> LayerNorm(E)
    stream 2: dilated Conv3d as (n2, K) @ (K, E) + bias (patches pre-gathered)
    epilogue: + positional encoding, prepend cls token, store the concatenated
              (1 + n1 + n2, E) block in one pass.
    """
    n1 = x1_ref.shape[0]

    # ---- stream 1: video_to_patch_embedding (LN stats in f32, matmul in bf16)
    x1 = x1_ref[...]                                            # (n1, K) f32
    xn = _layernorm_f32(x1, g1_ref[...], be1_ref[...])
    y1 = jnp.dot(xn.astype(jnp.bfloat16), w1_ref[...],
                 preferred_element_type=jnp.float32) + b1_ref[...]
    y1 = _layernorm_f32(y1, g2_ref[...], be2_ref[...])

    # ---- stream 2: dilated Conv3d as a matmul
    y2 = jnp.dot(x2_ref[...].astype(jnp.bfloat16), wc_ref[...],
                 preferred_element_type=jnp.float32) + bc_ref[...]

    # ---- fused positional-encoding add + cls concat (no extra HBM passes)
    y1 = y1 + pos1_ref[...]
    y2 = y2 + pos2_ref[...]
    o_ref[0:1, :] = cls_ref[...].astype(o_ref.dtype)
    o_ref[1:1 + n1, :] = y1.astype(o_ref.dtype)
    o_ref[1 + n1:, :] = y2.astype(o_ref.dtype)


def _video_token_call(vp, dp, w1, b1, g1, be1, g2, be2, wc, bc,
                      pos_video, cls_video):
    b, f, n1, K = vp.shape
    n2 = dp.shape[2]
    E = w1.shape[1]
    n_out = 1 + n1 + n2

    # Split the positional table so the kernel needs no in-kernel row slicing.
    pos1 = pos_video[:, :, :n1, :]
    pos2 = pos_video[:, :, n1:, :]

    row_map = lambda bi, fi: (bi, fi, 0, 0)   # per-(batch, frame) block
    pos_map = lambda bi, fi: (0, fi, 0, 0)    # shared over batch
    const2 = lambda bi, fi: (0, 0)            # resident weights / params

    cost = pl.CostEstimate(
        flops=2 * b * f * (n1 + n2) * K * E,
        transcendentals=2 * b * f * n1,  # rsqrt per row, two LayerNorms
        bytes_accessed=4 * (vp.size + dp.size + b * f * n_out * E
                            + pos_video.size + cls_video.size)
        + 2 * (w1.size + wc.size),
    )

    return pl.pallas_call(
        video_token_kernel,
        out_shape=jax.ShapeDtypeStruct((b, f, n_out, E), jnp.float32),
        grid=(b, f),
        in_specs=[
            pl.BlockSpec((None, None, n1, K), row_map),   # vp patches
            pl.BlockSpec((None, None, n2, K), row_map),   # dilated patches
            pl.BlockSpec((K, E), const2),                 # w1 (bf16, resident)
            pl.BlockSpec((1, E), const2),                 # linear bias
            pl.BlockSpec((1, K), const2),                 # LN1 gamma
            pl.BlockSpec((1, K), const2),                 # LN1 beta
            pl.BlockSpec((1, E), const2),                 # LN2 gamma
            pl.BlockSpec((1, E), const2),                 # LN2 beta
            pl.BlockSpec((K, E), const2),                 # conv weight (bf16)
            pl.BlockSpec((1, E), const2),                 # conv bias
            pl.BlockSpec((None, None, n1, E), pos_map),   # pos (stream 1)
            pl.BlockSpec((None, None, n2, E), pos_map),   # pos (stream 2)
            pl.BlockSpec((None, None, 1, E), row_map),    # cls token
        ],
        out_specs=pl.BlockSpec((None, None, n_out, E), row_map),
        compiler_params=pltpu.CompilerParams(
            dimension_semantics=("parallel", "parallel"),
            vmem_limit_bytes=48 * 1024 * 1024,  # headroom under v7x 64 MiB
        ),
        cost_estimate=cost,
    )(vp, dp, w1, b1, g1, be1, g2, be2, wc, bc, pos1, pos2, cls_video)


# ------------------------------- JAX glue ----------------------------------
# TODO(synk): move the dilated gather / pf-p1-p2 rearrange into the kernel's
# DMA layer (memory_space=pl.ANY + manual copies) so the K=384 patch-expanded
# tensors are never materialized in HBM.

def _rearrange_video_to_patches(video, pf, p1, p2):
    # 'b c (f pf) (h p1) (w p2) -> b f (h w) (p1 p2 pf c)'
    b, c, F, H, W = video.shape
    f, h, w = F // pf, H // p1, W // p2
    x = video.reshape(b, c, f, pf, h, p1, w, p2)
    x = jnp.transpose(x, (0, 2, 4, 6, 5, 7, 3, 1))  # b f h w p1 p2 pf c
    return x.reshape(b, f, h * w, p1 * p2 * pf * c)


def _extract_dilated_patches(video, kf, kh, kw, sf, sh, sw, df, dh, dw):
    # Gather the receptive fields of the dilated Conv3d so it becomes a matmul.
    b, c, F, H, W = video.shape
    out_f = (F - (df * (kf - 1) + 1)) // sf + 1
    out_h = (H - (dh * (kh - 1) + 1)) // sh + 1
    out_w = (W - (dw * (kw - 1) + 1)) // sw + 1
    f_idx = jnp.arange(out_f)[:, None] * sf + jnp.arange(kf)[None, :] * df
    h_idx = jnp.arange(out_h)[:, None] * sh + jnp.arange(kh)[None, :] * dh
    w_idx = jnp.arange(out_w)[:, None] * sw + jnp.arange(kw)[None, :] * dw
    xf = video[:, :, f_idx]                    # (b, c, of, kf, H, W)
    xh = xf[:, :, :, :, h_idx]                 # (b, c, of, kf, oh, kh, W)
    xw = xh[:, :, :, :, :, :, w_idx]           # (b, c, of, kf, oh, kh, ow, kw)
    p = jnp.transpose(xw, (0, 2, 4, 6, 1, 3, 5, 7))  # (b, of, oh, ow, c, kf, kh, kw)
    return p.reshape(b, out_f, out_h * out_w, c * kf * kh * kw), out_f, out_h, out_w


def _ln_jax(x):
    mu = jnp.mean(x, axis=-1, keepdims=True)
    var = jnp.mean(jnp.square(x - mu), axis=-1, keepdims=True)
    return (x - mu) * jax.lax.rsqrt(var + EPS)


def tokens_forward(video, current, *, image_patch_size=8, frame_patch_size=2,
                   embed_dim=36, dilation_rate=1, in_channels=3,
                   key=jax.random.PRNGKey(42)):
    """Faithful re-implementation of Tokens.forward (which draws fresh random
    parameters on every call); parameters here come deterministically from
    `key`. Dropout p=0.0 is the identity."""
    dil = dilation_rate + 1
    p1 = p2 = image_patch_size
    pf = frame_patch_size
    patch_dim = in_channels * p1 * p2 * pf

    # --- trim odd frame counts (matches the PyTorch forward) ---
    if video.shape[2] % 2 != 0:
        video = video[:, :, :-1, :, :]
        current = current[:, :-1, :]
    # Correctness fix from review: capture the frame count AFTER the trim so
    # pos_current always matches current_patches.
    b, c, F, H, W = video.shape
    f = F // pf
    frame = current.shape[1]

    # --- deterministic parameter construction ---
    ks = jax.random.split(key, 10)
    lim_v = 1.0 / jnp.sqrt(jnp.float32(patch_dim))
    w_vid = jax.random.uniform(ks[0], (patch_dim, embed_dim), jnp.float32, -lim_v, lim_v)
    b_vid = jax.random.uniform(ks[1], (1, embed_dim), jnp.float32, -lim_v, lim_v)
    g1_v = jnp.ones((1, patch_dim), jnp.float32)
    b1_v = jnp.zeros((1, patch_dim), jnp.float32)
    g2_v = jnp.ones((1, embed_dim), jnp.float32)
    b2_v = jnp.zeros((1, embed_dim), jnp.float32)

    lim_c = 1.0 / jnp.sqrt(jnp.float32(3))
    w_cur = jax.random.uniform(ks[2], (3, embed_dim), jnp.float32, -lim_c, lim_c)
    b_cur = jax.random.uniform(ks[3], (1, embed_dim), jnp.float32, -lim_c, lim_c)

    lim_k = 1.0 / jnp.sqrt(jnp.float32(patch_dim))
    conv_w = jax.random.uniform(ks[4], (embed_dim, in_channels, pf, p1, p2),
                                jnp.float32, -lim_k, lim_k)
    conv_b = jax.random.uniform(ks[5], (1, embed_dim), jnp.float32, -lim_k, lim_k)

    # --- patch gathers (plain-JAX glue) ---
    vp = _rearrange_video_to_patches(video, pf, p1, p2)          # (b, f, n1, K)
    n1 = vp.shape[2]
    dp, out_f, out_h, out_w = _extract_dilated_patches(
        video, pf, p1, p2, pf, p1, p2, 1, dil, dil)              # (b, f, n2, K)
    assert out_f == f, (out_f, f)
    n2 = out_h * out_w

    # --- positional encodings / cls tokens (fresh randn params, as in PyTorch) ---
    num_image_patches = n1 + n2
    pos_video = jax.random.normal(ks[6], (1, f, num_image_patches, embed_dim), jnp.float32)
    pos_current = jax.random.normal(ks[7], (1, frame, embed_dim), jnp.float32)
    cls_token = jax.random.normal(ks[8], (b, f, 1, embed_dim), jnp.float32)
    cls_token_current = jax.random.normal(ks[9], (b, 1, embed_dim), jnp.float32)

    # conv weight as (K, E) with rows in (c, kf, kh, kw) order (matches gather)
    wc = conv_w.reshape(embed_dim, patch_dim).T

    # MXU operands in bf16 (accumulation stays f32 inside the kernel)
    w_vid_bf16 = w_vid.astype(jnp.bfloat16)
    wc_bf16 = wc.astype(jnp.bfloat16)

    # --- fused video-token kernel: embed + conv + pos-add + cls concat ---
    video_token = _video_token_call(
        vp, dp, w_vid_bf16, b_vid, g1_v, b1_v, g2_v, b2_v,
        wc_bf16, conv_b, pos_video, cls_token)

    # --- current path: LN(3) -> Linear(3,E) -> LN(E) -> +pos -> cls ---
    # Tiny (B*T rows, K=3): handled by XLA per the perf review (a dedicated
    # pallas_call costs more in launch/DMA overhead than the work itself).
    cemb = _ln_jax(_ln_jax(current) @ w_cur + b_cur)
    current_token = jnp.concatenate([cls_token_current, cemb + pos_current], axis=1)

    return video_token, current_token


# --------------------------------- main ------------------------------------

if __name__ == "__main__":
    key = jax.random.PRNGKey(0)
    kv, kc, kp = jax.random.split(key, 3)
    # Small shapes consistent with the module: B=2, C=3, F=4 frames, 16x16
    # images, current signal (B, 4, 3).
    video = jax.random.normal(kv, (2, 3, 4, 16, 16), jnp.float32)
    current = jax.random.normal(kc, (2, 4, 3), jnp.float32)

    video_token, current_token = tokens_forward(video, current, key=kp)
    jax.block_until_ready((video_token, current_token))

    # Expected: video_token (2, 2, 4+1+1, 36); current_token (2, 5, 36)
    assert video_token.shape == (2, 2, 6, 36), video_token.shape
    assert current_token.shape == (2, 5, 36), current_token.shape
    assert video_token.dtype == jnp.float32 and current_token.dtype == jnp.float32
    print("KERNEL_OK")
</pallas_src>

<mosaic_0001>
module attributes {stable_mosaic.version = 11 : i64} {
  func.func @video_token_kernel(%arg0: i32, %arg1: i32, %arg2: memref<1x1x4x384xf32, #tpu.memory_space<vmem>>, %arg3: memref<1x1x1x384xf32, #tpu.memory_space<vmem>>, %arg4: memref<384x36xbf16, #tpu.memory_space<vmem>>, %arg5: memref<1x36xf32, #tpu.memory_space<vmem>>, %arg6: memref<1x384xf32, #tpu.memory_space<vmem>>, %arg7: memref<1x384xf32, #tpu.memory_space<vmem>>, %arg8: memref<1x36xf32, #tpu.memory_space<vmem>>, %arg9: memref<1x36xf32, #tpu.memory_space<vmem>>, %arg10: memref<384x36xbf16, #tpu.memory_space<vmem>>, %arg11: memref<1x36xf32, #tpu.memory_space<vmem>>, %arg12: memref<1x1x4x36xf32, #tpu.memory_space<vmem>>, %arg13: memref<1x1x1x36xf32, #tpu.memory_space<vmem>>, %arg14: memref<1x1x1x36xf32, #tpu.memory_space<vmem>>, %arg15: memref<1x1x6x36xf32, #tpu.memory_space<vmem>>) attributes {dimension_semantics = [#tpu.dimension_semantics<parallel>, #tpu.dimension_semantics<parallel>], iteration_bounds = array<i64: 2, 2>, scalar_prefetch = 0 : i64, scratch_operands = 0 : i64, tpu.core_type = #tpu.core_type<tc>, window_params = [{transform_indices = @transform_0, window_bounds = array<i64: 1, 1, 4, 384>}, {transform_indices = @transform_1, window_bounds = array<i64: 1, 1, 1, 384>}, {pipeline_mode = #tpu.pipeline_mode<synchronous>, transform_indices = @transform_2, window_bounds = array<i64: 384, 36>}, {pipeline_mode = #tpu.pipeline_mode<synchronous>, transform_indices = @transform_3, window_bounds = array<i64: 1, 36>}, {pipeline_mode = #tpu.pipeline_mode<synchronous>, transform_indices = @transform_4, window_bounds = array<i64: 1, 384>}, {pipeline_mode = #tpu.pipeline_mode<synchronous>, transform_indices = @transform_5, window_bounds = array<i64: 1, 384>}, {pipeline_mode = #tpu.pipeline_mode<synchronous>, transform_indices = @transform_6, window_bounds = array<i64: 1, 36>}, {pipeline_mode = #tpu.pipeline_mode<synchronous>, transform_indices = @transform_7, window_bounds = array<i64: 1, 36>}, {pipeline_mode = #tpu.pipeline_mode<synchronous>, transform_indices = @transform_8, window_bounds = array<i64: 384, 36>}, {pipeline_mode = #tpu.pipeline_mode<synchronous>, transform_indices = @transform_9, window_bounds = array<i64: 1, 36>}, {transform_indices = @transform_10, window_bounds = array<i64: 1, 1, 4, 36>}, {transform_indices = @transform_11, window_bounds = array<i64: 1, 1, 1, 36>}, {transform_indices = @transform_12, window_bounds = array<i64: 1, 1, 1, 36>}, {transform_indices = @transform_13, window_bounds = array<i64: 1, 1, 6, 36>}]} {
    %c0 = arith.constant 0 : index
    %c0_0 = arith.constant 0 : index
    %c0_1 = arith.constant 0 : index
    %c0_2 = arith.constant 0 : index
    %0 = vector.load %arg2[%c0, %c0_0, %c0_1, %c0_2] : memref<1x1x4x384xf32, #tpu.memory_space<vmem>>, vector<1x1x4x384xf32>
    %1 = vector.shape_cast %0 : vector<1x1x4x384xf32> to vector<4x384xf32>
    %c0_3 = arith.constant 0 : index
    %c0_4 = arith.constant 0 : index
    %2 = vector.load %arg6[%c0_3, %c0_4] : memref<1x384xf32, #tpu.memory_space<vmem>>, vector<1x384xf32>
    %c0_5 = arith.constant 0 : index
    %c0_6 = arith.constant 0 : index
    %3 = vector.load %arg7[%c0_5, %c0_6] : memref<1x384xf32, #tpu.memory_space<vmem>>, vector<1x384xf32>
    %cst = arith.constant dense<0.000000e+00> : vector<4xf32>
    %4 = vector.multi_reduction <add>, %1, %cst [1] : vector<4x384xf32> to vector<4xf32>
    %5 = vector.shape_cast %4 : vector<4xf32> to vector<4x1xf32>
    %cst_7 = arith.constant 3.840000e+02 : f32
    %6 = vector.broadcast %cst_7 : f32 to vector<4x1xf32>
    %7 = arith.divf %5, %6 : vector<4x1xf32>
    %8 = arith.mulf %1, %1 : vector<4x384xf32>
    %cst_8 = arith.constant dense<0.000000e+00> : vector<4xf32>
    %9 = vector.multi_reduction <add>, %8, %cst_8 [1] : vector<4x384xf32> to vector<4xf32>
    %10 = vector.shape_cast %9 : vector<4xf32> to vector<4x1xf32>
    %cst_9 = arith.constant 3.840000e+02 : f32
    %11 = vector.broadcast %cst_9 : f32 to vector<4x1xf32>
    %12 = arith.divf %10, %11 : vector<4x1xf32>
    %13 = arith.mulf %7, %7 : vector<4x1xf32>
    %14 = arith.subf %12, %13 : vector<4x1xf32>
    %15 = vector.broadcast %7 : vector<4x1xf32> to vector<4x384xf32>
    %16 = arith.subf %1, %15 : vector<4x384xf32>
    %cst_10 = arith.constant 9.99999974E-6 : f32
    %17 = vector.broadcast %cst_10 : f32 to vector<4x1xf32>
    %18 = arith.addf %14, %17 : vector<4x1xf32>
    %19 = math.rsqrt %18 : vector<4x1xf32>
    %20 = vector.broadcast %19 : vector<4x1xf32> to vector<4x384xf32>
    %21 = arith.mulf %16, %20 : vector<4x384xf32>
    %22 = vector.broadcast %2 : vector<1x384xf32> to vector<4x384xf32>
    %23 = arith.mulf %21, %22 : vector<4x384xf32>
    %24 = vector.broadcast %3 : vector<1x384xf32> to vector<4x384xf32>
    %25 = arith.addf %23, %24 : vector<4x384xf32>
    %26 = arith.truncf %25 : vector<4x384xf32> to vector<4x384xbf16>
    %c0_11 = arith.constant 0 : index
    %c0_12 = arith.constant 0 : index
    %27 = vector.load %arg4[%c0_11, %c0_12] : memref<384x36xbf16, #tpu.memory_space<vmem>>, vector<384x36xbf16>
    %cst_13 = arith.constant dense<0.000000e+00> : vector<4x36xf32>
    %28 = tpu.matmul %26, %27, %cst_13 {dimension_numbers = #tpu.dot_dimension_numbers<[1], [0], [0], [1], [0, 0, 1, 1], [], []>} : vector<4x384xbf16>, vector<384x36xbf16>, vector<4x36xf32> -> vector<4x36xf32>
    %c0_14 = arith.constant 0 : index
    %c0_15 = arith.constant 0 : index
    %29 = vector.load %arg5[%c0_14, %c0_15] : memref<1x36xf32, #tpu.memory_space<vmem>>, vector<1x36xf32>
    %30 = vector.broadcast %29 : vector<1x36xf32> to vector<4x36xf32>
    %31 = arith.addf %28, %30 : vector<4x36xf32>
    %c0_16 = arith.constant 0 : index
    %c0_17 = arith.constant 0 : index
    %32 = vector.load %arg8[%c0_16, %c0_17] : memref<1x36xf32, #tpu.memory_space<vmem>>, vector<1x36xf32>
    %c0_18 = arith.constant 0 : index
    %c0_19 = arith.constant 0 : index
    %33 = vector.load %arg9[%c0_18, %c0_19] : memref<1x36xf32, #tpu.memory_space<vmem>>, vector<1x36xf32>
    %cst_20 = arith.constant dense<0.000000e+00> : vector<4xf32>
    %34 = vector.multi_reduction <add>, %31, %cst_20 [1] : vector<4x36xf32> to vector<4xf32>
    %35 = vector.shape_cast %34 : vector<4xf32> to vector<4x1xf32>
    %cst_21 = arith.constant 3.600000e+01 : f32
    %36 = vector.broadcast %cst_21 : f32 to vector<4x1xf32>
    %37 = arith.divf %35, %36 : vector<4x1xf32>
    %38 = arith.mulf %31, %31 : vector<4x36xf32>
    %cst_22 = arith.constant dense<0.000000e+00> : vector<4xf32>
    %39 = vector.multi_reduction <add>, %38, %cst_22 [1] : vector<4x36xf32> to vector<4xf32>
    %40 = vector.shape_cast %39 : vector<4xf32> to vector<4x1xf32>
    %cst_23 = arith.constant 3.600000e+01 : f32
    %41 = vector.broadcast %cst_23 : f32 to vector<4x1xf32>
    %42 = arith.divf %40, %41 : vector<4x1xf32>
    %43 = arith.mulf %37, %37 : vector<4x1xf32>
    %44 = arith.subf %42, %43 : vector<4x1xf32>
    %45 = vector.broadcast %37 : vector<4x1xf32> to vector<4x36xf32>
    %46 = arith.subf %31, %45 : vector<4x36xf32>
    %cst_24 = arith.constant 9.99999974E-6 : f32
    %47 = vector.broadcast %cst_24 : f32 to vector<4x1xf32>
    %48 = arith.addf %44, %47 : vector<4x1xf32>
    %49 = math.rsqrt %48 : vector<4x1xf32>
    %50 = vector.broadcast %49 : vector<4x1xf32> to vector<4x36xf32>
    %51 = arith.mulf %46, %50 : vector<4x36xf32>
    %52 = vector.broadcast %32 : vector<1x36xf32> to vector<4x36xf32>
    %53 = arith.mulf %51, %52 : vector<4x36xf32>
    %54 = vector.broadcast %33 : vector<1x36xf32> to vector<4x36xf32>
    %55 = arith.addf %53, %54 : vector<4x36xf32>
    %c0_25 = arith.constant 0 : index
    %c0_26 = arith.constant 0 : index
    %c0_27 = arith.constant 0 : index
    %c0_28 = arith.constant 0 : index
    %56 = vector.load %arg3[%c0_25, %c0_26, %c0_27, %c0_28] : memref<1x1x1x384xf32, #tpu.memory_space<vmem>>, vector<1x1x1x384xf32>
    %57 = vector.shape_cast %56 : vector<1x1x1x384xf32> to vector<1x384xf32>
    %58 = arith.truncf %57 : vector<1x384xf32> to vector<1x384xbf16>
    %c0_29 = arith.constant 0 : index
    %c0_30 = arith.constant 0 : index
    %59 = vector.load %arg10[%c0_29, %c0_30] : memref<384x36xbf16, #tpu.memory_space<vmem>>, vector<384x36xbf16>
    %cst_31 = arith.constant dense<0.000000e+00> : vector<1x36xf32>
    %60 = tpu.matmul %58, %59, %cst_31 {dimension_numbers = #tpu.dot_dimension_numbers<[1], [0], [0], [1], [0, 0, 1, 1], [], []>} : vector<1x384xbf16>, vector<384x36xbf16>, vector<1x36xf32> -> vector<1x36xf32>
    %c0_32 = arith.constant 0 : index
    %c0_33 = arith.constant 0 : index
    %61 = vector.load %arg11[%c0_32, %c0_33] : memref<1x36xf32, #tpu.memory_space<vmem>>, vector<1x36xf32>
    %62 = arith.addf %60, %61 : vector<1x36xf32>
    %c0_34 = arith.constant 0 : index
    %c0_35 = arith.constant 0 : index
    %c0_36 = arith.constant 0 : index
    %c0_37 = arith.constant 0 : index
    %63 = vector.load %arg12[%c0_34, %c0_35, %c0_36, %c0_37] : memref<1x1x4x36xf32, #tpu.memory_space<vmem>>, vector<1x1x4x36xf32>
    %64 = vector.shape_cast %63 : vector<1x1x4x36xf32> to vector<4x36xf32>
    %65 = arith.addf %55, %64 : vector<4x36xf32>
    %c0_38 = arith.constant 0 : index
    %c0_39 = arith.constant 0 : index
    %c0_40 = arith.constant 0 : index
    %c0_41 = arith.constant 0 : index
    %66 = vector.load %arg13[%c0_38, %c0_39, %c0_40, %c0_41] : memref<1x1x1x36xf32, #tpu.memory_space<vmem>>, vector<1x1x1x36xf32>
    %67 = vector.shape_cast %66 : vector<1x1x1x36xf32> to vector<1x36xf32>
    %68 = arith.addf %62, %67 : vector<1x36xf32>
    %c0_42 = arith.constant 0 : index
    %c0_43 = arith.constant 0 : index
    %c0_44 = arith.constant 0 : index
    %c0_45 = arith.constant 0 : index
    %69 = vector.load %arg14[%c0_42, %c0_43, %c0_44, %c0_45] : memref<1x1x1x36xf32, #tpu.memory_space<vmem>>, vector<1x1x1x36xf32>
    %70 = vector.shape_cast %69 : vector<1x1x1x36xf32> to vector<1x36xf32>
    %c0_46 = arith.constant 0 : index
    %c0_47 = arith.constant 0 : index
    %c0_48 = arith.constant 0 : index
    %c0_49 = arith.constant 0 : index
    %71 = vector.load %arg15[%c0_46, %c0_47, %c0_48, %c0_49] : memref<1x1x6x36xf32, #tpu.memory_space<vmem>>, vector<1x1x1x36xf32>
    %72 = vector.shape_cast %71 : vector<1x1x1x36xf32> to vector<1x36xf32>
    %73 = vector.shape_cast %70 : vector<1x36xf32> to vector<1x1x1x36xf32>
    tpu.vector_store %arg15[%c0_46, %c0_47, %c0_48, %c0_49], %73 {strides = array<i32>} : memref<1x1x6x36xf32, #tpu.memory_space<vmem>>, vector<1x1x1x36xf32>,
    %c0_50 = arith.constant 0 : index
    %c0_51 = arith.constant 0 : index
    %c1 = arith.constant 1 : index
    %c0_52 = arith.constant 0 : index
    %74 = vector.load %arg15[%c0_50, %c0_51, %c1, %c0_52] : memref<1x1x6x36xf32, #tpu.memory_space<vmem>>, vector<1x1x4x36xf32>
    %75 = vector.shape_cast %74 : vector<1x1x4x36xf32> to vector<4x36xf32>
    %76 = vector.shape_cast %65 : vector<4x36xf32> to vector<1x1x4x36xf32>
    tpu.vector_store %arg15[%c0_50, %c0_51, %c1, %c0_52], %76 {strides = array<i32>} : memref<1x1x6x36xf32, #tpu.memory_space<vmem>>, vector<1x1x4x36xf32>,
    %c0_53 = arith.constant 0 : index
    %c0_54 = arith.constant 0 : index
    %c5 = arith.constant 5 : index
    %c0_55 = arith.constant 0 : index
    %77 = vector.load %arg15[%c0_53, %c0_54, %c5, %c0_55] : memref<1x1x6x36xf32, #tpu.memory_space<vmem>>, vector<1x1x1x36xf32>
    %78 = vector.shape_cast %77 : vector<1x1x1x36xf32> to vector<1x36xf32>
    %79 = vector.shape_cast %68 : vector<1x36xf32> to vector<1x1x1x36xf32>
    tpu.vector_store %arg15[%c0_53, %c0_54, %c5, %c0_55], %79 {strides = array<i32>} : memref<1x1x6x36xf32, #tpu.memory_space<vmem>>, vector<1x1x1x36xf32>,
    return
  }
  func.func @transform_0(%arg0: i32, %arg1: i32) -> (i32, i32, i32, i32) {
    %c0_i32 = arith.constant 0 : i32
    %c0_i32_0 = arith.constant 0 : i32
    %c0_i32_1 = arith.constant 0 : i32
    return %arg0, %arg1, %c0_i32, %c0_i32_0 : i32, i32, i32, i32
  }
  func.func @transform_1(%arg0: i32, %arg1: i32) -> (i32, i32, i32, i32) {
    %c0_i32 = arith.constant 0 : i32
    %c0_i32_0 = arith.constant 0 : i32
    %c0_i32_1 = arith.constant 0 : i32
    return %arg0, %arg1, %c0_i32, %c0_i32_0 : i32, i32, i32, i32
  }
  func.func @transform_2(%arg0: i32, %arg1: i32) -> (i32, i32) {
    %c0_i32 = arith.constant 0 : i32
    %c0_i32_0 = arith.constant 0 : i32
    %c0_i32_1 = arith.constant 0 : i32
    return %c0_i32, %c0_i32_0 : i32, i32
  }
  func.func @transform_3(%arg0: i32, %arg1: i32) -> (i32, i32) {
    %c0_i32 = arith.constant 0 : i32
    %c0_i32_0 = arith.constant 0 : i32
    %c0_i32_1 = arith.constant 0 : i32
    return %c0_i32, %c0_i32_0 : i32, i32
  }
  func.func @transform_4(%arg0: i32, %arg1: i32) -> (i32, i32) {
    %c0_i32 = arith.constant 0 : i32
    %c0_i32_0 = arith.constant 0 : i32
    %c0_i32_1 = arith.constant 0 : i32
    return %c0_i32, %c0_i32_0 : i32, i32
  }
  func.func @transform_5(%arg0: i32, %arg1: i32) -> (i32, i32) {
    %c0_i32 = arith.constant 0 : i32
    %c0_i32_0 = arith.constant 0 : i32
    %c0_i32_1 = arith.constant 0 : i32
    return %c0_i32, %c0_i32_0 : i32, i32
  }
  func.func @transform_6(%arg0: i32, %arg1: i32) -> (i32, i32) {
    %c0_i32 = arith.constant 0 : i32
    %c0_i32_0 = arith.constant 0 : i32
    %c0_i32_1 = arith.constant 0 : i32
    return %c0_i32, %c0_i32_0 : i32, i32
  }
  func.func @transform_7(%arg0: i32, %arg1: i32) -> (i32, i32) {
    %c0_i32 = arith.constant 0 : i32
    %c0_i32_0 = arith.constant 0 : i32
    %c0_i32_1 = arith.constant 0 : i32
    return %c0_i32, %c0_i32_0 : i32, i32
  }
  func.func @transform_8(%arg0: i32, %arg1: i32) -> (i32, i32) {
    %c0_i32 = arith.constant 0 : i32
    %c0_i32_0 = arith.constant 0 : i32
    %c0_i32_1 = arith.constant 0 : i32
    return %c0_i32, %c0_i32_0 : i32, i32
  }
  func.func @transform_9(%arg0: i32, %arg1: i32) -> (i32, i32) {
    %c0_i32 = arith.constant 0 : i32
    %c0_i32_0 = arith.constant 0 : i32
    %c0_i32_1 = arith.constant 0 : i32
    return %c0_i32, %c0_i32_0 : i32, i32
  }
  func.func @transform_10(%arg0: i32, %arg1: i32) -> (i32, i32, i32, i32) {
    %c0_i32 = arith.constant 0 : i32
    %c0_i32_0 = arith.constant 0 : i32
    %c0_i32_1 = arith.constant 0 : i32
    %c0_i32_2 = arith.constant 0 : i32
    return %c0_i32, %arg1, %c0_i32_0, %c0_i32_1 : i32, i32, i32, i32
  }
  func.func @transform_11(%arg0: i32, %arg1: i32) -> (i32, i32, i32, i32) {
    %c0_i32 = arith.constant 0 : i32
    %c0_i32_0 = arith.constant 0 : i32
    %c0_i32_1 = arith.constant 0 : i32
    %c0_i32_2 = arith.constant 0 : i32
    return %c0_i32, %arg1, %c0_i32_0, %c0_i32_1 : i32, i32, i32, i32
  }
  func.func @transform_12(%arg0: i32, %arg1: i32) -> (i32, i32, i32, i32) {
    %c0_i32 = arith.constant 0 : i32
    %c0_i32_0 = arith.constant 0 : i32
    %c0_i32_1 = arith.constant 0 : i32
    return %arg0, %arg1, %c0_i32, %c0_i32_0 : i32, i32, i32, i32
  }
  func.func @transform_13(%arg0: i32, %arg1: i32) -> (i32, i32, i32, i32) {
    %c0_i32 = arith.constant 0 : i32
    %c0_i32_0 = arith.constant 0 : i32
    %c0_i32_1 = arith.constant 0 : i32
    return %arg0, %arg1, %c0_i32, %c0_i32_0 : i32, i32, i32, i32
  }
}

</mosaic_0001>

<bundles_post_ra>
// kernel: tpu_custom_call.1
= control target key start
LH: loop header
LB: loop body
LE: loop exit
PB: predicated region body
PF: predicated region fallthrough
CT: control target
= control target key end

     0   :  { %s1797_s25 = smov 0   ;;  %s1799_s26 = smov 0   ;;  %s2088_s0 = inlined_call_operand.vmem [shape: f32[2,2,4,384], index: 0, kind: input, shape index: {}]   ;;  %s2089_s1 = inlined_call_operand.vmem [shape: f32[2,2,1,384], index: 1, kind: input, shape index: {}]   ;;  %s2090_s2 = inlined_call_operand.vmem [shape: bf16[384,36], index: 2, kind: input, shape index: {}]   ;;  %s2091_s3 = inlined_call_operand.vmem [shape: f32[1,36], index: 3, kind: input, shape index: {}]   ;;  %s2092_s4 = inlined_call_operand.vmem [shape: f32[1,384], index: 4, kind: input, shape index: {}]   ;;  %s2093_s5 = inlined_call_operand.vmem [shape: f32[1,384], index: 5, kind: input, shape index: {}]   ;;  %s2094_s6 = inlined_call_operand.vmem [shape: f32[1,36], index: 6, kind: input, shape index: {}]   ;;  %s2095_s7 = inlined_call_operand.vmem [shape: f32[1,36], index: 7, kind: input, shape index: {}]   ;;  %s2096_s8 = inlined_call_operand.vmem [shape: bf16[384,36], index: 8, kind: input, shape index: {}]   ;;  %s2097_s9 = inlined_call_operand.vmem [shape: f32[1,36], index: 9, kind: input, shape index: {}]   ;;  %s2098_s10 = inlined_call_operand.vmem [shape: f32[1,2,4,36], index: 10, kind: input, shape index: {}]   ;;  %s2099_s11 = inlined_call_operand.vmem [shape: f32[1,2,1,36], index: 11, kind: input, shape index: {}]   ;;  %s2100_s12 = inlined_call_operand.vmem [shape: f32[2,2,1,36], index: 12, kind: input, shape index: {}]   ;;  %s2101_s13 = inlined_call_operand.vmem [shape: f32[2,2,6,36], index: 13, kind: output, shape index: {}]  }
   0x1   :  { %2102 = sst [smem:[#allocation2_spill]] %s2088_s0  ;;  %s1801_s27 = smov 0  }
   0x2   :  { %2103 = sst [smem:[#allocation3_spill]] %s2089_s1  ;;  %s1803_s28 = smov 0  }
   0x3   :  { %s1805_s29 = smov 0  }
   0x4 LB: > { %s32_s30 = sadd.s32 1, %s1714_s27  ;;  %s35_s14 = sadd.s32 1, %s1718_s28  ;;  %s1722_s29 = sphi %s1805_s29, %s23_s29   ;;  %s1718_s28 = sphi %s1803_s28, %s2109_s28   ;;  %s1714_s27 = sphi %s1801_s27, %s2108_s27   ;;  %s1710_s26 = sphi %s1799_s26, %s2107_s26   ;;  %s1706_s25 = sphi %s1797_s25, %s2106_s25  }
   0x5   : > { %p33_p0 = scmp.ge.s32.totalorder %s32_s30, 2  ;;  %p1425_p1 = scmp.ge.s32.totalorder %s1722_s29, 1 }
   0x6   : > { %p453_p2 = scmp.lt.s32.totalorder %s1722_s29, 5 }
   0x7   : > { %s2111_s30 = smov (%p33_p0, %s32_s30), 0  ;;  %s2113_s14 = smov (!%p33_p0, %s35_s14), %s1718_s28 }
   0x8   : > { %p454_p3 = pnand %p1425_p1, %p453_p2  ;;  %p37_p4 = scmp.ge.s32.totalorder %s2113_s14, 2 }
   0x9   : > { %p526_p5 = scmp.lt.s32.totalorder (!%p454_p3), %s1710_s26, 1  ;;  %p528_p6 = scmp.lt.s32.totalorder (!%p454_p3), %s1706_s25, 1  ;;  %v1724_v0 = vmov (!%p454_p3), 0.0   ;;  %vm573_vm0 = vcmask (!%p454_p3), 1043456   ;;  %v1632_v17 = vld [vmem:[%s2090_s2 + $0x80] sm:$0xff] (!%p454_p3)   ;;  %v1635_v20 = vld [vmem:[%s2090_s2 + $0x88] sm:$0xff] (!%p454_p3)   ;;  %v602_v49 = vlaneseq (!%p454_p3) }
   0xa   : > { %s2115_s14 = smov (%p37_p4, %s2113_s14), 0  ;;  %457 = sbr.rel (%p454_p3) target bundleno = 600 (0x258), region = 72 }
   0xb   : > { %1546 = vmatprep.subr.bf16.mxu1 (!%p454_p3), %v1724_v0  ;;  %s2104_s0 = sld [smem:[#allocation2_spill]] (!%p454_p3)  ;;  %v1633_v18 = vld [vmem:[%s2090_s2 + $0x40] sm:$0xff] (!%p454_p3)   ;;  %v1636_v21 = vld [vmem:[%s2090_s2 + $0x48] sm:$0xff] (!%p454_p3)   ;;  %v1638_v23 = vld [vmem:[%s2090_s2 + $0x90] sm:$0xff] (!%p454_p3)   ;;  %vm1725_vm1 = vmmov (!%p454_p3), 0   ;;  %v603_v53 = vshrl.u32 (!%p454_p3), %v602_v49, 7 }
   0xc   : > { %1547 = vmatpush3.bf16.msra.mxu1 (!%p454_p3), %v1632_v17  ;;  %v1634_v19 = vld [vmem:[%s2090_s2] sm:$0xff] (!%p454_p3)   ;;  %1484 = vmatprep.subr.bf16.mxu0 (!%p454_p3), %v1633_v18  ;;  %v1637_v22 = vld [vmem:[%s2090_s2 + $0x8] sm:$0xff] (!%p454_p3)   ;;  %v1639_v24 = vld [vmem:[%s2090_s2 + $0x50] sm:$0xff] (!%p454_p3)   ;;  %v1726_v47 = vmov (!%p454_p3), 839922192   ;;  %s2105_s1 = sld [smem:[#allocation3_spill]] (!%p454_p3) }
   0xd   : > { %1548 = vmatprep.subr.bf16.mxu1 (!%p454_p3), %v1724_v0  ;;  %1485 = vmatpush3.bf16.msra.mxu0 (!%p454_p3), %v1634_v19  ;;  %v1640_v25 = vld [vmem:[%s2090_s2 + $0x10] sm:$0xff] (!%p454_p3)   ;;  %v1641_v26 = vld [vmem:[%s2090_s2 + $0x98] sm:$0xff] (!%p454_p3)   ;;  %v1644_v29 = vld [vmem:[%s2090_s2 + $0xa0] sm:$0xff] (!%p454_p3)   ;;  %v600_v48 = vunpack.c.l.s4 (!%p454_p3), %v1726_v47  ;;  %v1937_v55 = vsub.s32 (!%p454_p3), 0, %v603_v53  ;;  %v629_v56 = vsub.s32 (!%p454_p3), 1, %v603_v53  ;;  %v1945_v59 = vsub.s32 (!%p454_p3), 2, %v603_v53 }
   0xe   : > { %1486 = vmatprep.subr.bf16.mxu0 (!%p454_p3), %v1636_v21  ;;  %v1642_v27 = vld [vmem:[%s2090_s2 + $0x58] sm:$0xff] (!%p454_p3)   ;;  %1562 = vmatprep.mubr.msk.bf16.mxu1 (!%p454_p3), %vm1725_vm1, %v1724_v0  ;;  %v1645_v30 = vld [vmem:[%s2090_s2 + $0x60] sm:$0xff] (!%p454_p3)   ;;  %v1647_v32 = vld [vmem:[%s2090_s2 + $0xa8] sm:$0xff] (!%p454_p3)   ;;  %vm945_vm2 = vcmask (!%p454_p3), 289792   ;;  %vm1274_vm3 = vcmask (!%p454_p3), 286720  }
   0xf   : > { %v1643_v28 = vld [vmem:[%s2090_s2 + $0x18] sm:$0xff] (!%p454_p3)   ;;  %v1646_v31 = vld [vmem:[%s2090_s2 + $0x20] sm:$0xff] (!%p454_p3)   ;;  %v1648_v33 = vld [vmem:[%s2090_s2 + $0x68] sm:$0xff] (!%p454_p3)   ;;  %v601_v52 = vunpack.c.0.s8 (!%p454_p3), %v600_v48 }
  0x10   : > { %1549 = vmatpush3.bf16.msra.mxu1 (!%p454_p3), %v1635_v20  ;;  %v1649_v34 = vld [vmem:[%s2090_s2 + $0x28] sm:$0xff] (!%p454_p3)   ;;  %v1650_v35 = vld [vmem:[%s2090_s2 + $0xb0] sm:$0xff] (!%p454_p3)   ;;  %v1653_v38 = vld [vmem:[%s2090_s2 + $0xb8] sm:$0xff] (!%p454_p3)  }
  0x11   : > { %s2117_s26 = smov (!%p526_p5, %s1710_s26), 1  ;;  %s2119_s25 = smov (!%p528_p6, %s1706_s25), 1  ;;  %1550 = vmatprep.subr.bf16.mxu1 %v1724_v0  ;;  %1487 = vmatpush3.bf16.msra.mxu0 %v1637_v22  ;;  %v1651_v36 = vld [vmem:[%s2090_s2 + $0x70] sm:$0xff]   ;;  %v1654_v39 = vld [vmem:[%s2090_s2 + $0x78] sm:$0xff]   ;;  %v1656_v41 = vld [vmem:[%s2096_s8 + $0x40] sm:$0xff]   ;;  %v604_v54 = vsub.s32 %v601_v52, %v603_v53 }
  0x12   : > { %s1587_s15 = smul.u32 6, %s2117_s26  ;;  %1488 = vmatprep.subr.bf16.mxu0 %v1639_v24  ;;  %v1652_v37 = vld [vmem:[%s2090_s2 + $0x30] sm:$0xff]   ;;  %v1655_v40 = vld [vmem:[%s2090_s2 + $0x38] sm:$0xff]   ;;  %v568_v57 = vld [vmem:[%s2092_s4] sm:$0x7]  ;;  %s1428_s19 = sshll.u32 %s2117_s26, 1 }
  0x13   : > { %s1586_s16 = smul.u32 3, %s2119_s25  ;;  %v569_v58 = vld [vmem:[%s2093_s5] sm:$0x7]  ;;  %v626_v61 = vrot.slane %v568_v57, %v1937_v55  ;;  %v630_v62 = vrot.slane %v568_v57, %v629_v56  ;;  %v1677_v47 = vld [vmem:[%s2096_s8 + $0x38] sm:$0xff]   ;;  %s1427_s26 = sshll.u32 %s2119_s25, 2 }
  0x14   : > { %1551 = vmatpush3.bf16.msra.mxu1 %v1638_v23  ;;  %v644_v63 = vrot.slane %v569_v58, %v1937_v55  ;;  %v1657_v22 = vld [vmem:[%s2096_s8] sm:$0xff]  }
  0x15   : > { %s1834_s17 = sadd.s32 %s1587_s15, %s1586_s16  ;;  %1552 = vmatprep.subr.bf16.mxu1 %v1724_v0  ;;  %1489 = vmatpush3.bf16.msra.mxu0 %v1640_v25  ;;  %v1658_v25 = vld [vmem:[%s2096_s8 + $0x48] sm:$0xff]  }
  0x16   : > { %s1426_s18 = sshll.u32 %s1834_s17, 2  ;;  %1490 = vmatprep.subr.bf16.mxu0 %v1642_v27  ;;  %s542_s20 = scalar_lea.vmem %s2105_s1, %s1834_s17  ;;  %v1659_v27 = vld [vmem:[%s2096_s8 + $0x8] sm:$0xff]  }
  0x17   : > { %s534_s21 = scalar_lea.vmem %s2104_s0, %s1426_s18  ;;  %s549_s18 = scalar_lea.vmem %s2099_s11, %s2119_s25 }
  0x18   : > { %v1840_v1 = vld [vmem:[%s534_s21] sm:$0xff]  ;;  %v1842_v2 = vld [vmem:[%s534_s21 + $0x8] sm:$0xf]  ;;  %1553 = vmatpush3.bf16.msra.mxu1 %v1641_v26 }
  0x19   : > { %v571_v3 = vcombine.high %v1840_v1, %v1840_v1  ;;  %v574_v4 = vsel %vm573_vm0, %v1840_v1, 0.0  ;;  %v577_v5 = vsel %vm573_vm0, %v1842_v2, 0.0  ;;  %v583_v6 = vmul.f32 %v1840_v1, %v1840_v1  ;;  %1554 = vmatprep.subr.bf16.mxu1 %v1724_v0  ;;  %1491 = vmatpush3.bf16.msra.mxu0 %v1643_v28  ;;  %v1663_v26 = vld [vmem:[%s2096_s8 + $0x88] sm:$0xff]   ;;  %v1661_v28 = vld [vmem:[%s2096_s8 + $0x50] sm:$0xff]  }
  0x1a   : > { %v584_v7 = vmul.f32 %v1842_v2, %v1842_v2  ;;  %1492 = vmatprep.subr.bf16.mxu0 %v1645_v30  ;;  %v1662_v30 = vld [vmem:[%s2096_s8 + $0x10] sm:$0xff]  }
  0x1b   : > { %v575_v8 = vsel %vm573_vm0, %v571_v3, 0.0  ;;  %v586_v9 = vcombine.high %v583_v6, %v583_v6  ;;  %v588_v10 = vsel %vm573_vm0, %v583_v6, 0.0  ;;  %v648_v3 = vrot.slane %v569_v58, %v629_v56 }
  0x1c   : > { %v576_v11 = vadd.f32 %v575_v8, %v574_v4  ;;  %v591_v13 = vsel %vm573_vm0, %v584_v7, 0.0  ;;  %1555 = vmatpush3.bf16.msra.mxu1 %v1644_v29  ;;  %v1666_v29 = vld [vmem:[%s2096_s8 + $0x90] sm:$0xff]  }
  0x1d   : > { %v589_v12 = vsel %vm573_vm0, %v586_v9, 0.0  ;;  %1556 = vmatprep.subr.bf16.mxu1 %v1724_v0  ;;  %1493 = vmatpush3.bf16.msra.mxu0 %v1646_v31  ;;  %v636_v9 = vcombine.low %v626_v61, %v630_v62  ;;  %v1664_v31 = vld [vmem:[%s2096_s8 + $0x58] sm:$0xff]  }
  0x1e   : > { %v578_v14 = vadd.f32 %v577_v5, %v576_v11  ;;  %v590_v15 = vadd.f32 %v589_v12, %v588_v10  ;;  %1494 = vmatprep.subr.bf16.mxu0 %v1648_v33  ;;  %v634_v5 = vrot.slane %v568_v57, %v1945_v59  ;;  %v652_v11 = vrot.slane %v569_v58, %v1945_v59  ;;  %v1665_v33 = vld [vmem:[%s2096_s8 + $0x18] sm:$0xff]  }
  0x20   : > { %579 = vadd.xlane.f32.xlu0 %v578_v14  ;;  %v592_v16 = vadd.f32 %v591_v13, %v590_v15  ;;  %1557 = vmatpush3.bf16.msra.mxu1 %v1647_v32  ;;  %v654_v13 = vcombine.low %v644_v63, %v648_v3  ;;  %v1957_v14 = vld [vmem:[%s542_s20] sm:$0x7]  ;;  %v1669_v32 = vld [vmem:[%s2096_s8 + $0x98] sm:$0xff]   ;;  %s555_s20 = sadd.s32 %s1428_s19, %s2119_s25 }
  0x21   : > { %1558 = vmatprep.subr.bf16.mxu1 %v1724_v0  ;;  %1495 = vmatpush3.bf16.msra.mxu0 %v1649_v34  ;;  %v985_v19 = vrot.slane %v1957_v14, %v629_v56  ;;  %v1667_v34 = vld [vmem:[%s2096_s8 + $0x60] sm:$0xff]   ;;  %s556_s22 = scalar_lea.vmem %s2100_s12, %s555_s20  ;;  %s1430_s0 = sshll.u32 %s555_s20, 3 }
  0x22   : > { %1496 = vmatprep.subr.bf16.mxu0 %v1651_v36  ;;  %v1668_v36 = vld [vmem:[%s2096_s8 + $0x20] sm:$0xff]   ;;  %s564_s1 = scalar_lea.vmem %s2101_s13, %s1430_s0  ;;  %s546_s20 = scalar_lea.vmem %s2098_s10, %s1427_s26 }
  0x23   : > { %v994_v23 = vpack.c.bf16 %v985_v19, %v985_v19 }
  0x24   : > { %593 = vadd.xlane.f32.xlu0 %v592_v16  ;;  %1559 = vmatpush3.bf16.msra.mxu1 %v1650_v35  ;;  %v1672_v35 = vld [vmem:[%s2096_s8 + $0xa0] sm:$0xff]  }
  0x25   : > { %1560 = vmatprep.subr.bf16.mxu1 %v1724_v0  ;;  %1497 = vmatpush3.bf16.msra.mxu0 %v1652_v37  ;;  %v1670_v37 = vld [vmem:[%s2096_s8 + $0x68] sm:$0xff]  }
  0x26   : > { %1498 = vmatprep.subr.bf16.mxu0 %v1654_v39  ;;  %v1671_v39 = vld [vmem:[%s2096_s8 + $0x28] sm:$0xff]  }
  0x28   : > { %1561 = vmatpush3.bf16.msra.mxu1 %v1653_v38  ;;  %v1675_v38 = vld [vmem:[%s2096_s8 + $0xa8] sm:$0xff]  }
  0x29   : > { %1566 = vmatprep.subr.bf16.mxu1 %v1724_v0  ;;  %1499 = vmatpush3.bf16.msra.mxu0 %v1655_v40  ;;  %v1673_v40 = vld [vmem:[%s2096_s8 + $0x70] sm:$0xff]  }
  0x2a   : > { %1515 = vmatprep.subr.bf16.mxu0 %v1656_v41  ;;  %v1678_v41 = vld [vmem:[%s2096_s8 + $0xb0] sm:$0xff]  }
  0xad   : > { %v580_v42 = vpop.xlane.xlu0 %579 }
  0xae   : > { %v582_v43 = vmul.f32 0.0026041667, %v580_v42  ;;  %v1674_v42 = vld [vmem:[%s2096_s8 + $0x30] sm:$0xff]  }
  0xb0   : > { %v596_v45 = vmul.f32 %v582_v43, %v582_v43  ;;  %v605_v60 = vrot.slane %v582_v43, %v604_v54  ;;  %v989_v43 = vrot.slane %v1957_v14, %v1945_v59 }
  0xb1   : > { %v594_v44 = vpop.xlane.xlu0 %593 }
  0xb2   : > { %v595_v46 = vmul.f32 0.0026041667, %v594_v44  ;;  %v607_v6 = vsub.f32 %v1840_v1, %v605_v60  ;;  %v608_v7 = vsub.f32 %v1842_v2, %v605_v60  ;;  %v1660_v1 = vld [vmem:[%s2096_s8 + $0x80] sm:$0xff]   ;;  %v1676_v44 = vld [vmem:[%s2096_s8 + $0x78] sm:$0xff]   ;;  %v995_v48 = vpack.c.bf16 %v989_v43, %v989_v43 }
  0xb4   : > { %v597_v50 = vsub.f32 %v595_v46, %v596_v45  ;;  %v1679_v45 = vld [vmem:[%s2096_s8 + $0xb8] sm:$0xff]   ;;  %v981_v46 = vrot.slane %v1957_v14, %v1937_v55 }
  0xb6   : > { %v609_v51 = vadd.f32 1e-05, %v597_v50  ;;  %v993_v49 = vpack.c.bf16 %v981_v46, %v981_v46 }
  0xb8   : > { %1680 = vrsqrt.f32 %v609_v51 }
  0xc2   : > { %v1681_v4 = vpop.eup %1680 }
  0xc3   : > { %v618_v8 = vrot.slane %v1681_v4, %v604_v54  ;;  %v1431_v54 = vld [vmem:[%s2091_s3] ss:$0 sm:$0xff] }
  0xc5   : > { %v621_v10 = vmul.f32 %v618_v8, %v608_v7  ;;  %v620_v12 = vmul.f32 %v618_v8, %v607_v6  ;;  %v1044_v8 = vld [vmem:[%s2097_s9] sm:$0x1] }
  0xc7   : > { %v639_v15 = vmul.f32 %v634_v5, %v621_v10  ;;  %v638_v16 = vmul.f32 %v636_v9, %v620_v12 }
  0xc9   : > { %v657_v17 = vadd.f32 %v652_v11, %v639_v15  ;;  %v656_v18 = vadd.f32 %v654_v13, %v638_v16  ;;  %v1271_v15 = vld [vmem:[%s549_s18] sm:$0x1] }
  0xcb   : > { %v663_v2 = vpack.c.bf16 %v657_v17, %v657_v17  ;;  %v659_v20 = vcombine.high %v656_v18, %v656_v18  ;;  %v661_v24 = vpack.c.bf16 %v656_v18, %v656_v18  ;;  %v1273_v17 = vld [vmem:[%s556_s22] sm:$0x1] }
  0xcc   : > { %1275 = vst.msk [vmem:[%s564_s1] sm:$0x1] %vm1274_vm3, %v1273_v17 }
  0xcd   : > { %1563 = vmatmul.mubr.bf16.vlgmr.msra.gmra.mrb[0].mxu1 %v663_v2  ;;  %v662_v21 = vpack.c.bf16 %v659_v20, %v659_v20 }
  0xce   : > { %1567 = vmatpush3.bf16.msra.mxu1 %v1660_v1  ;;  %1582 = vmatprep.mubr.msk.bf16.mxu1 %vm1725_vm1, %v1724_v0 }
  0xcf   : > { %895 = vmatprep.mubr.bf16.mxu0 %v662_v21  ;;  %1568 = vmatprep.subr.bf16.mxu1 %v1724_v0 }
  0xd0   : > { %896 = vmatmul.mubr.bf16.vlgmr.msra.gmra.mrb[0].mxu0 %v661_v24 }
  0xd1   : > { %1516 = vmatpush3.bf16.msra.mxu0 %v1657_v22  ;;  %1221 = vmatprep.mubr.bf16.mxu0 %v994_v23 }
  0xd2   : > { %1517 = vmatprep.subr.bf16.mxu0 %v1658_v25  ;;  %1569 = vmatpush3.bf16.msra.mxu1 %v1663_v26  ;;  %v1456_v25 = vld [vmem:[%s2094_s6] ss:$0 sm:$0xff] }
  0xd3   : > { %1570 = vmatprep.subr.bf16.mxu1 %v1724_v0 }
  0xd5   : > { %1518 = vmatpush3.bf16.msra.mxu0 %v1659_v27  ;;  %v1457_v27 = vld [vmem:[%s2095_s7] ss:$0 sm:$0xff] }
  0xd6   : > { %1519 = vmatprep.subr.bf16.mxu0 %v1661_v28  ;;  %1571 = vmatpush3.bf16.msra.mxu1 %v1666_v29  ;;  %v1269_v29 = vld [vmem:[%s546_s20] sm:$0xf] }
  0xd7   : > { %1572 = vmatprep.subr.bf16.mxu1 %v1724_v0 }
  0xd9   : > { %1520 = vmatpush3.bf16.msra.mxu0 %v1662_v30 }
  0xda   : > { %1521 = vmatprep.subr.bf16.mxu0 %v1664_v31  ;;  %1573 = vmatpush3.bf16.msra.mxu1 %v1669_v32 }
  0xdb   : > { %1574 = vmatprep.subr.bf16.mxu1 %v1724_v0 }
  0xdd   : > { %1522 = vmatpush3.bf16.msra.mxu0 %v1665_v33 }
  0xde   : > { %1523 = vmatprep.subr.bf16.mxu0 %v1667_v34  ;;  %1575 = vmatpush3.bf16.msra.mxu1 %v1672_v35 }
  0xdf   : > { %1576 = vmatprep.subr.bf16.mxu1 %v1724_v0 }
  0xe1   : > { %1524 = vmatpush3.bf16.msra.mxu0 %v1668_v36 }
  0xe2   : > { %1525 = vmatprep.subr.bf16.mxu0 %v1670_v37  ;;  %1577 = vmatpush3.bf16.msra.mxu1 %v1675_v38 }
  0xe3   : > { %1578 = vmatprep.subr.bf16.mxu1 %v1724_v0 }
  0xe5   : > { %1526 = vmatpush3.bf16.msra.mxu0 %v1671_v39 }
  0xe6   : > { %1527 = vmatprep.subr.bf16.mxu0 %v1673_v40  ;;  %1579 = vmatpush3.bf16.msra.mxu1 %v1678_v41 }
  0xe7   : > { %1580 = vmatprep.subr.bf16.mxu1 %v1724_v0 }
  0xe9   : > { %1528 = vmatpush3.bf16.msra.mxu0 %v1674_v42 }
  0xea   : > { %1529 = vmatprep.subr.bf16.mxu0 %v1676_v44  ;;  %1581 = vmatpush3.bf16.msra.mxu1 %v1679_v45 }
  0xed   : > { %1530 = vmatpush3.bf16.msra.mxu0 %v1677_v47  ;;  %1583 = vmatmul.mubr.bf16.vlgmr.msra.gmra.mrb[4].mxu1 %v995_v48 }
  0xf0   : > { %1222 = vmatmul.mubr.bf16.vlgmr.msra.gmra.mrb[4].mxu0 %v993_v49 }
 0x1a0   : > { %v937_v50 = vpop.f32.mrb[0].mxu1 }
 0x1a1   : > { %v1564_v51 = vpop.f32.mrb[1].mxu1 }
 0x1a2   : > { %v940_v52 = vpop.f32.mrb[2].mxu1 }
 0x1a3   : > { %v1500_v53 = vpop.f32.mrb[0].mxu0  ;;  %v1565_v0 = vpop.f32.mrb[3].mxu1 }
 0x1a4   : > { %v1501_v55 = vpop.f32.mrb[1].mxu0 }
 0x1a5   : > { %v1502_v56 = vadd.f32 %v1501_v55, %v1500_v53  ;;  %v1503_v57 = vpop.f32.mrb[2].mxu0 }
 0x1a6   : > { %v1504_v58 = vpop.f32.mrb[3].mxu0 }
 0x1a7   : > { %v898_v59 = vadd.f32 %v1502_v56, %v1431_v54 }
 0x1a9   : > { %v938_v60 = vadd.f32 %v937_v50, %v898_v59 }
 0x1ab   : > { %v946_v61 = vsel %vm945_vm2, %v938_v60, 0.0  ;;  %v951_v62 = vmul.f32 %v938_v60, %v938_v60 }
 0x1ac   : > { %947 = vadd.xlane.f32.xlu1 %v946_v61 }
 0x1ad   : > { %v952_v63 = vsel %vm945_vm2, %v951_v62, 0.0 }
 0x1b0   : > { %953 = vadd.xlane.f32.xlu1 %v952_v63 }
 0x1c0   : > { %v1263_v9 = vpop.f32.mrb[4].mxu1 }
 0x1c1   : > { %v1584_v11 = vpop.f32.mrb[5].mxu1 }
 0x1c2   : > { %v1266_v12 = vpop.f32.mrb[6].mxu1 }
 0x1c3   : > { %v1531_v3 = vpop.f32.mrb[4].mxu0  ;;  %v1585_v14 = vpop.f32.mrb[7].mxu1 }
 0x1c4   : > { %v1532_v4 = vpop.f32.mrb[5].mxu0 }
 0x1c5   : > { %v1534_v5 = vpop.f32.mrb[6].mxu0  ;;  %v1533_v7 = vadd.f32 %v1532_v4, %v1531_v3 }
 0x1c6   : > { %v1535_v6 = vpop.f32.mrb[7].mxu0 }
 0x1c7   : > { %v1224_v10 = vadd.f32 %v1533_v7, %v1044_v8 }
 0x1c9   : > { %v1264_v13 = vadd.f32 %v1263_v9, %v1224_v10 }
 0x1cb   : > { %v1272_v16 = vadd.f32 %v1271_v15, %v1264_v13 }
 0x1cd   : > { %1277 = vst.msk [vmem:[%s564_s1 + $0x5] sm:$0x1] %vm1274_vm3, %v1272_v16 }
 0x239   : > { %v948_v18 = vpop.xlane.xlu1 %947 }
 0x23a   : > { %v950_v19 = vmul.f32 0.027777778, %v948_v18 }
 0x23c   : > { %v956_v2 = vmul.f32 %v950_v19, %v950_v19  ;;  %v958_v23 = vsub.f32 %v938_v60, %v950_v19 }
 0x23d   : > { %v954_v1 = vpop.xlane.xlu1 %953 }
 0x23e   : > { %v955_v20 = vmul.f32 0.027777778, %v954_v1 }
 0x240   : > { %v957_v21 = vsub.f32 %v955_v20, %v956_v2 }
 0x242   : > { %v959_v22 = vadd.f32 1e-05, %v957_v21 }
 0x244   : > { %1682 = vrsqrt.f32 %v959_v22 }
 0x24e   : > { %v1683_v24 = vpop.eup %1682 }
 0x24f   : > { %v961_v26 = vmul.f32 %v1683_v24, %v958_v23 }
 0x251   : > { %v968_v28 = vmul.f32 %v1456_v25, %v961_v26 }
 0x253   : > { %v975_v30 = vadd.f32 %v1457_v27, %v968_v28 }
 0x255   : > { %v1270_v31 = vadd.f32 %v1269_v29, %v975_v30 }
 0x257   : > { %1276 = vst.msk [vmem:[%s564_s1 + $0x1] sm:$0xf] %vm945_vm2, %v1270_v31 }
 0x258 PF: > { %s23_s29 = sadd.s32 1, %s1722_s29   ;;  %s2106_s25 = smov %s1714_s27 }
 0x259   : > { %p20_p7 = scmp.ge.s32.totalorder %s23_s29, 6   ;;  %s2107_s26 = smov %s1718_s28 }
 0x25a   : > { %s2108_s27 = smov %s2111_s30  ;;  %s2109_s28 = smov %s2115_s14 }
 0x25b   :  { %22 = sbr.rel (!%p20_p7) target bundleno = 4 (0x4), region = 114 }

</bundles_post_ra>
